<compile_context>
chip_gen: v6e
topology: v6e:2x2x1
jax: 0.10.0
libtpu: 0.0.40
codegen_flags: <defaults>
</compile_context>

<pallas_src>
import math
import numpy as np
import jax
import jax.numpy as jnp
from jax.experimental import pallas as pl
from jax.experimental.pallas import tpu as pltpu

TARGET_TILE_ROWS = 1024  # token rows per grid step (HBM-roofline sweet spot on v5e/v6e/v7x)
MAX_PE_TILE_ROWS = 4096  # fall back to unfused PE if the PE period is pathologically large
LANE = 128


def _round_up(a, m):
    return ((a + m - 1) // m) * m


# ----------------------------- Pallas kernels ------------------------------ #
def _mlp2_pe_kernel(x_ref, v_ref, pe_ref, w1_ref, b1_ref, w2_ref, b2_ref, o_ref):
    """Fused: Linear->ReLU->Linear->ReLU, valid masking, learned-PE add, on a token tile."""
    x = x_ref[...].astype(jnp.bfloat16)                                    # (T, D_in)
    h = jnp.dot(x, w1_ref[...], preferred_element_type=jnp.float32) + b1_ref[...]
    h = jnp.maximum(h, 0.0)
    h = jnp.dot(h.astype(jnp.bfloat16), w2_ref[...],
                preferred_element_type=jnp.float32) + b2_ref[...]
    h = jnp.maximum(h, 0.0)
    # masked_fill(~valid, 0) == multiply non-negative output by {0,1}; PE added after mask.
    # The cast to o_ref.dtype (possibly bf16) is the very last op before the store.
    o_ref[...] = (h * v_ref[...] + pe_ref[...]).astype(o_ref.dtype)


def _mlp2_kernel(x_ref, v_ref, w1_ref, b1_ref, w2_ref, b2_ref, o_ref):
    """Fallback (PE period too large to fuse): masked 2-layer MLP only."""
    x = x_ref[...].astype(jnp.bfloat16)
    h = jnp.dot(x, w1_ref[...], preferred_element_type=jnp.float32) + b1_ref[...]
    h = jnp.maximum(h, 0.0)
    h = jnp.dot(h.astype(jnp.bfloat16), w2_ref[...],
                preferred_element_type=jnp.float32) + b2_ref[...]
    h = jnp.maximum(h, 0.0)
    o_ref[...] = (h * v_ref[...]).astype(o_ref.dtype)


# ------------------------- one-time parameter prep ------------------------- #
def _make_stream_plan(w1, b1, w2, b2, pe_inner, t_inner, n_tok):
    """Pad/cast the per-stream parameters once and pick the token tile size.

    pe_inner: [t_inner, H] learned PE broadcast to one batch element's token layout.
    """
    hidden = w1.shape[1]
    h_pad = _round_up(hidden, LANE)
    pad_h = h_pad - hidden

    # Zero pads propagate as exact zeros through both layers -> extra columns are 0.
    w1p = jnp.pad(w1, ((0, 0), (0, pad_h))).astype(jnp.bfloat16)
    w2p = jnp.pad(w2, ((0, pad_h), (0, pad_h))).astype(jnp.bfloat16)
    b1p = jnp.pad(b1, ((0, 0), (0, pad_h))).astype(jnp.float32)
    b2p = jnp.pad(b2, ((0, 0), (0, pad_h))).astype(jnp.float32)
    pep = jnp.pad(pe_inner, ((0, 0), (0, pad_h))).astype(jnp.float32)

    # Tile rows: multiple of 8 (sublane) and, for fused PE, of the PE period so every
    # tile start is PE-aligned.
    base = math.lcm(t_inner, 8)
    fuse_pe = base <= MAX_PE_TILE_ROWS
    if not fuse_pe:
        base = 8
    n_base_blocks = max(1, pl.cdiv(n_tok, base))
    reps = max(1, min(pl.cdiv(TARGET_TILE_ROWS, base), n_base_blocks))
    # v7x has 2 TensorCores per chip: keep >= 2 parallel grid steps whenever the
    # stream has enough rows, so a single launch never leaves one TC idle.
    if n_base_blocks >= 2 and pl.cdiv(n_tok, base * reps) < 2:
        reps = max(1, (n_base_blocks + 1) // 2)
    tile_n = base * reps

    pe_tile = None
    if fuse_pe:
        assert tile_n % t_inner == 0  # PE alignment invariant (see correctness notes)
        pe_tile = jnp.tile(pep, (tile_n // t_inner, 1))  # (tile_n, h_pad), small
    return {
        "w1": w1p, "b1": b1p, "w2": w2p, "b2": b2p,
        "pe_tile": pe_tile,
        "hidden": hidden, "h_pad": h_pad, "tile_n": tile_n,
        "t_inner": t_inner, "fuse_pe": fuse_pe,
        # raw f32 copies kept only for the pure-JAX reference / unfused-PE fallback
        "raw": (w1, b1, w2, b2, pe_inner),
    }


def prepare_params(params, *, n_scene, n_target, n_step_hist, n_other, n_map,
                   n_pl_node, n_tl):
    """One-time prep: pad/cast weights, build per-stream PE layouts and tile plans."""
    H = params["fc_target"][0].shape[1]
    n_batch = n_scene * n_target
    pe_tl = jnp.broadcast_to(params["pe_tl"][0], (n_step_hist, n_tl, H)).reshape(-1, H)
    pe_map = jnp.broadcast_to(params["pe_map"][0, 0], (n_map, n_pl_node, H)).reshape(-1, H)
    pe_other = jnp.broadcast_to(params["pe_other"][0, 0], (n_other, n_step_hist, H)).reshape(-1, H)
    pe_target = params["pe_target"][0]                                       # (S, H)
    return {
        "hidden": H,
        "tl": _make_stream_plan(*params["fc_tl"], pe_tl,
                                n_step_hist * n_tl, n_batch * n_step_hist * n_tl),
        "map": _make_stream_plan(*params["fc_map"], pe_map,
                                 n_map * n_pl_node, n_batch * n_map * n_pl_node),
        "other": _make_stream_plan(*params["fc_other"], pe_other,
                                   n_other * n_step_hist, n_batch * n_other * n_step_hist),
        "target": _make_stream_plan(*params["fc_target"], pe_target,
                                    n_step_hist, n_batch * n_step_hist),
    }


# ------------------------------ projection --------------------------------- #
def mlp_project(x, valid, plan, out_dtype=jnp.float32):
    """Masked 2-layer MLP + learned-PE add for one stream.

    x: [B, *inner, D_in], valid: [B, *inner] bool.  Returns [B, *inner, H] out_dtype.
    """
    lead = x.shape[:-1]
    d_in = x.shape[-1]
    hidden, h_pad, tile_n = plan["hidden"], plan["h_pad"], plan["tile_n"]
    n_tok = int(np.prod(lead))

    xf = x.reshape(n_tok, d_in)
    vf = valid.reshape(n_tok, 1).astype(jnp.float32)
    grid = (pl.cdiv(n_tok, tile_n),)

    x_spec = pl.BlockSpec((tile_n, d_in), lambda i: (i, 0))      # token tile
    v_spec = pl.BlockSpec((tile_n, 1), lambda i: (i, 0))         # valid column
    w_specs = [
        pl.BlockSpec((d_in, h_pad), lambda i: (0, 0)),           # W1 (fetched once)
        pl.BlockSpec((1, h_pad), lambda i: (0, 0)),              # b1
        pl.BlockSpec((h_pad, h_pad), lambda i: (0, 0)),          # W2
        pl.BlockSpec((1, h_pad), lambda i: (0, 0)),              # b2
    ]
    out_spec = pl.BlockSpec((tile_n, h_pad), lambda i: (i, 0))
    cparams = pltpu.CompilerParams(dimension_semantics=("parallel",))

    if plan["fuse_pe"]:
        pe_spec = pl.BlockSpec((tile_n, h_pad), lambda i: (0, 0))  # PE tile (grid-invariant)
        out = pl.pallas_call(
            _mlp2_pe_kernel,
            out_shape=jax.ShapeDtypeStruct((n_tok, h_pad), out_dtype),
            grid=grid,
            in_specs=[x_spec, v_spec, pe_spec] + w_specs,
            out_specs=out_spec,
            compiler_params=cparams,
        )(xf, vf, plan["pe_tile"], plan["w1"], plan["b1"], plan["w2"], plan["b2"])
    else:
        # TODO(synk): fallback does a wrapper-side PE add (extra read+write of the
        # embedding); only hit if the PE period exceeds MAX_PE_TILE_ROWS.
        out = pl.pallas_call(
            _mlp2_kernel,
            out_shape=jax.ShapeDtypeStruct((n_tok, h_pad), jnp.float32),
            grid=grid,
            in_specs=[x_spec, v_spec] + w_specs,
            out_specs=out_spec,
            compiler_params=cparams,
        )(xf, vf, plan["w1"], plan["b1"], plan["w2"], plan["b2"])

    if h_pad != hidden:
        out = out[:, :hidden]
    out = out.reshape(*lead, hidden)
    if not plan["fuse_pe"]:
        pe_inner = plan["raw"][4]
        out = (out + pe_inner.reshape((1,) + lead[1:] + (hidden,))).astype(out_dtype)
    return out


# --------------------------- parameter creation ---------------------------- #
def init_params(key, hidden_dim, agent_attr_dim, map_attr_dim, tl_attr_dim,
                n_step_hist, n_pl_node):
    def linear(k, d_in, d_out):
        kw, kb = jax.random.split(k)
        bound = 1.0 / np.sqrt(d_in)
        w = jax.random.uniform(kw, (d_in, d_out), jnp.float32, -bound, bound)
        b = jax.random.uniform(kb, (1, d_out), jnp.float32, -bound, bound)
        return w, b

    def mlp2(k, d_in, h):
        k1, k2 = jax.random.split(k)
        w1, b1 = linear(k1, d_in, h)
        w2, b2 = linear(k2, h, h)
        return (w1, b1, w2, b2)

    keys = jax.random.split(key, 8)
    params = {
        "fc_tl": mlp2(keys[0], tl_attr_dim, hidden_dim),
        "fc_target": mlp2(keys[1], agent_attr_dim, hidden_dim),
        "fc_other": mlp2(keys[2], agent_attr_dim, hidden_dim),
        "fc_map": mlp2(keys[3], map_attr_dim, hidden_dim),
        # PyTorch inits the learned PEs to zeros; use small deterministic
        # non-zero values here so the PE-add path is actually exercised.
        "pe_target": 0.01 * jax.random.normal(keys[4], (1, n_step_hist, hidden_dim)),
        "pe_other": 0.01 * jax.random.normal(keys[5], (1, 1, n_step_hist, hidden_dim)),
        "pe_map": 0.01 * jax.random.normal(keys[6], (1, 1, n_pl_node, hidden_dim)),
        "pe_tl": 0.01 * jax.random.normal(keys[7], (1, n_step_hist, 1, hidden_dim)),
    }
    return params


# ------------------------------ forward pass ------------------------------- #
def input_projections_forward(prepped, target_valid, target_attr, other_valid,
                              other_attr, map_valid, map_attr, tl_valid, tl_attr,
                              project=mlp_project, out_dtype=jnp.float32):
    """pl_aggr=False, use_point_net=False, use_current_tl=False, add_learned_pe=True."""
    n_scene, n_target = target_valid.shape[:2]
    n_batch = n_scene * n_target
    H = prepped["hidden"]

    # flatten(0, 1) — agent-centric batching
    tl_valid = tl_valid.reshape((n_batch,) + tl_valid.shape[2:])           # [B, S, n_tl]
    tl_attr = tl_attr.reshape((n_batch,) + tl_attr.shape[2:])
    map_valid = map_valid.reshape((n_batch,) + map_valid.shape[2:])        # [B, n_map, n_pl]
    map_attr = map_attr.reshape((n_batch,) + map_attr.shape[2:])
    other_valid = other_valid.reshape((n_batch,) + other_valid.shape[2:])  # [B, n_other, S]
    other_attr = other_attr.reshape((n_batch,) + other_attr.shape[2:])
    target_valid = target_valid.reshape((n_batch,) + target_valid.shape[2:])  # [B, S]
    target_attr = target_attr.reshape((n_batch,) + target_attr.shape[2:])

    # masked MLP projections + PE add (Pallas kernel, one launch per stream)
    tl_emb = project(tl_attr, tl_valid, prepped["tl"], out_dtype)              # [B, S, n_tl, H]
    map_emb = project(map_attr, map_valid, prepped["map"], out_dtype)          # [B, n_map, n_pl, H]
    other_emb = project(other_attr, other_valid, prepped["other"], out_dtype)  # [B, n_other, S, H]
    target_emb = project(target_attr, target_valid, prepped["target"], out_dtype)  # [B, S, H]

    # flatten(1, 2)
    tl_emb = tl_emb.reshape(n_batch, -1, H)
    tl_valid = tl_valid.reshape(n_batch, -1)
    map_emb = map_emb.reshape(n_batch, -1, H)
    map_valid = map_valid.reshape(n_batch, -1)
    other_emb = other_emb.reshape(n_batch, -1, H)
    other_valid = other_valid.reshape(n_batch, -1)

    return (target_emb, target_valid, other_emb, other_valid,
            tl_emb, tl_valid, map_emb, map_valid)


# ------------------------------- reference --------------------------------- #
def _mlp_ref(x, valid, plan, out_dtype=jnp.float32):
    """Pure-JAX reference of the fused projection (same bf16 matmul inputs, f32 accum)."""
    w1, b1, w2, b2, pe_inner = plan["raw"]
    hidden = w1.shape[1]
    xb = x.astype(jnp.bfloat16)
    h = jnp.dot(xb, w1.astype(jnp.bfloat16), preferred_element_type=jnp.float32) + b1[0]
    h = jnp.maximum(h, 0.0)
    h = jnp.dot(h.astype(jnp.bfloat16), w2.astype(jnp.bfloat16),
                preferred_element_type=jnp.float32) + b2[0]
    h = jnp.maximum(h, 0.0)
    h = jnp.where(valid[..., None], h, 0.0)
    h = h + pe_inner.reshape((1,) + x.shape[1:-1] + (hidden,))
    return h.astype(out_dtype)


# --------------------------------- main ------------------------------------ #
if __name__ == "__main__":
    # small shapes consistent with the module's forward (pl_aggr=False)
    n_scene, n_target = 2, 2
    n_step_hist, n_other, n_map, n_pl_node, n_tl = 4, 3, 3, 2, 2
    hidden_dim, agent_attr_dim, map_attr_dim, tl_attr_dim = 32, 16, 12, 8

    key = jax.random.PRNGKey(0)
    kp, k1, k2, k3, k4, k5, k6, k7, k8 = jax.random.split(key, 9)

    params = init_params(kp, hidden_dim, agent_attr_dim, map_attr_dim, tl_attr_dim,
                         n_step_hist, n_pl_node)
    prepped = prepare_params(params, n_scene=n_scene, n_target=n_target,
                             n_step_hist=n_step_hist, n_other=n_other, n_map=n_map,
                             n_pl_node=n_pl_node, n_tl=n_tl)

    target_valid = jax.random.bernoulli(k1, 0.8, (n_scene, n_target, n_step_hist))
    target_attr = jax.random.normal(k2, (n_scene, n_target, n_step_hist, agent_attr_dim))
    other_valid = jax.random.bernoulli(k3, 0.8, (n_scene, n_target, n_other, n_step_hist))
    other_attr = jax.random.normal(k4, (n_scene, n_target, n_other, n_step_hist, agent_attr_dim))
    map_valid = jax.random.bernoulli(k5, 0.8, (n_scene, n_target, n_map, n_pl_node))
    map_attr = jax.random.normal(k6, (n_scene, n_target, n_map, n_pl_node, map_attr_dim))
    tl_valid = jax.random.bernoulli(k7, 0.8, (n_scene, n_target, n_step_hist, n_tl))
    tl_attr = jax.random.normal(k8, (n_scene, n_target, n_step_hist, n_tl, tl_attr_dim))

    args = (target_valid, target_attr, other_valid, other_attr,
            map_valid, map_attr, tl_valid, tl_attr)

    # ---- f32 output path (matches the PyTorch module dtype exactly) ----
    outs = input_projections_forward(prepped, *args)
    outs = jax.block_until_ready(outs)
    outs_ref = input_projections_forward(prepped, *args, project=_mlp_ref)
    outs_ref = jax.block_until_ready(outs_ref)
    for o, r in zip(outs, outs_ref):
        np.testing.assert_allclose(np.asarray(o, dtype=np.float32),
                                   np.asarray(r, dtype=np.float32),
                                   rtol=1e-3, atol=1e-3)

    # ---- bf16 output path (halves the dominant HBM writeback; downstream encoder dtype) ----
    outs_bf16 = input_projections_forward(prepped, *args, out_dtype=jnp.bfloat16)
    outs_bf16 = jax.block_until_ready(outs_bf16)
    outs_bf16_ref = input_projections_forward(prepped, *args, project=_mlp_ref,
                                              out_dtype=jnp.bfloat16)
    outs_bf16_ref = jax.block_until_ready(outs_bf16_ref)
    for o, r in zip(outs_bf16, outs_bf16_ref):
        np.testing.assert_allclose(np.asarray(o, dtype=np.float32),
                                   np.asarray(r, dtype=np.float32),
                                   rtol=1e-2, atol=1e-2)

    # expected output shapes (pl_aggr=False path)
    n_batch = n_scene * n_target
    assert outs[0].shape == (n_batch, n_step_hist, hidden_dim)
    assert outs[1].shape == (n_batch, n_step_hist)
    assert outs[2].shape == (n_batch, n_other * n_step_hist, hidden_dim)
    assert outs[3].shape == (n_batch, n_other * n_step_hist)
    assert outs[4].shape == (n_batch, n_step_hist * n_tl, hidden_dim)
    assert outs[5].shape == (n_batch, n_step_hist * n_tl)
    assert outs[6].shape == (n_batch, n_map * n_pl_node, hidden_dim)
    assert outs[7].shape == (n_batch, n_map * n_pl_node)
    assert outs_bf16[0].dtype == jnp.bfloat16

    print("KERNEL_OK")
</pallas_src>

<mosaic_0001>
module attributes {stable_mosaic.version = 11 : i64} {
  func.func @_mlp2_pe_kernel(%arg0: i32, %arg1: memref<16x8xf32, #tpu.memory_space<vmem>>, %arg2: memref<16x1xf32, #tpu.memory_space<vmem>>, %arg3: memref<16x128xf32, #tpu.memory_space<vmem>>, %arg4: memref<8x128xbf16, #tpu.memory_space<vmem>>, %arg5: memref<1x128xf32, #tpu.memory_space<vmem>>, %arg6: memref<128x128xbf16, #tpu.memory_space<vmem>>, %arg7: memref<1x128xf32, #tpu.memory_space<vmem>>, %arg8: memref<16x128xf32, #tpu.memory_space<vmem>>) attributes {dimension_semantics = [#tpu.dimension_semantics<parallel>], iteration_bounds = array<i64: 2>, scalar_prefetch = 0 : i64, scratch_operands = 0 : i64, tpu.core_type = #tpu.core_type<tc>, window_params = [{transform_indices = @transform_0, window_bounds = array<i64: 16, 8>}, {transform_indices = @transform_1, window_bounds = array<i64: 16, 1>}, {pipeline_mode = #tpu.pipeline_mode<synchronous>, transform_indices = @transform_2, window_bounds = array<i64: 16, 128>}, {pipeline_mode = #tpu.pipeline_mode<synchronous>, transform_indices = @transform_3, window_bounds = array<i64: 8, 128>}, {pipeline_mode = #tpu.pipeline_mode<synchronous>, transform_indices = @transform_4, window_bounds = array<i64: 1, 128>}, {pipeline_mode = #tpu.pipeline_mode<synchronous>, transform_indices = @transform_5, window_bounds = array<i64: 128, 128>}, {pipeline_mode = #tpu.pipeline_mode<synchronous>, transform_indices = @transform_6, window_bounds = array<i64: 1, 128>}, {transform_indices = @transform_7, window_bounds = array<i64: 16, 128>}]} {
    %c0 = arith.constant 0 : index
    %c0_0 = arith.constant 0 : index
    %0 = vector.load %arg1[%c0, %c0_0] : memref<16x8xf32, #tpu.memory_space<vmem>>, vector<16x8xf32>
    %1 = arith.truncf %0 : vector<16x8xf32> to vector<16x8xbf16>
    %c0_1 = arith.constant 0 : index
    %c0_2 = arith.constant 0 : index
    %2 = vector.load %arg4[%c0_1, %c0_2] : memref<8x128xbf16, #tpu.memory_space<vmem>>, vector<8x128xbf16>
    %cst = arith.constant dense<0.000000e+00> : vector<16x128xf32>
    %3 = tpu.matmul %1, %2, %cst {dimension_numbers = #tpu.dot_dimension_numbers<[1], [0], [0], [1], [0, 0, 1, 1], [], []>} : vector<16x8xbf16>, vector<8x128xbf16>, vector<16x128xf32> -> vector<16x128xf32>
    %c0_3 = arith.constant 0 : index
    %c0_4 = arith.constant 0 : index
    %4 = vector.load %arg5[%c0_3, %c0_4] : memref<1x128xf32, #tpu.memory_space<vmem>>, vector<1x128xf32>
    %5 = vector.broadcast %4 : vector<1x128xf32> to vector<16x128xf32>
    %6 = arith.addf %3, %5 : vector<16x128xf32>
    %cst_5 = arith.constant 0.000000e+00 : f32
    %7 = vector.broadcast %cst_5 : f32 to vector<16x128xf32>
    %8 = arith.maximumf %6, %7 : vector<16x128xf32>
    %9 = arith.truncf %8 : vector<16x128xf32> to vector<16x128xbf16>
    %c0_6 = arith.constant 0 : index
    %c0_7 = arith.constant 0 : index
    %10 = vector.load %arg6[%c0_6, %c0_7] : memref<128x128xbf16, #tpu.memory_space<vmem>>, vector<128x128xbf16>
    %cst_8 = arith.constant dense<0.000000e+00> : vector<16x128xf32>
    %11 = tpu.matmul %9, %10, %cst_8 {dimension_numbers = #tpu.dot_dimension_numbers<[1], [0], [0], [1], [0, 0, 1, 1], [], []>} : vector<16x128xbf16>, vector<128x128xbf16>, vector<16x128xf32> -> vector<16x128xf32>
    %c0_9 = arith.constant 0 : index
    %c0_10 = arith.constant 0 : index
    %12 = vector.load %arg7[%c0_9, %c0_10] : memref<1x128xf32, #tpu.memory_space<vmem>>, vector<1x128xf32>
    %13 = vector.broadcast %12 : vector<1x128xf32> to vector<16x128xf32>
    %14 = arith.addf %11, %13 : vector<16x128xf32>
    %cst_11 = arith.constant 0.000000e+00 : f32
    %15 = vector.broadcast %cst_11 : f32 to vector<16x128xf32>
    %16 = arith.maximumf %14, %15 : vector<16x128xf32>
    %c0_12 = arith.constant 0 : index
    %c0_13 = arith.constant 0 : index
    %17 = vector.load %arg2[%c0_12, %c0_13] : memref<16x1xf32, #tpu.memory_space<vmem>>, vector<16x1xf32>
    %18 = vector.broadcast %17 : vector<16x1xf32> to vector<16x128xf32>
    %19 = arith.mulf %16, %18 : vector<16x128xf32>
    %c0_14 = arith.constant 0 : index
    %c0_15 = arith.constant 0 : index
    %20 = vector.load %arg3[%c0_14, %c0_15] : memref<16x128xf32, #tpu.memory_space<vmem>>, vector<16x128xf32>
    %21 = arith.addf %19, %20 : vector<16x128xf32>
    %c0_16 = arith.constant 0 : index
    %c0_17 = arith.constant 0 : index
    %22 = vector.load %arg8[%c0_16, %c0_17] : memref<16x128xf32, #tpu.memory_space<vmem>>, vector<16x128xf32>
    tpu.vector_store %arg8[%c0_16, %c0_17], %21 {strides = array<i32>} : memref<16x128xf32, #tpu.memory_space<vmem>>, vector<16x128xf32>,
    return
  }
  func.func @transform_0(%arg0: i32) -> (i32, i32) {
    %c0_i32 = arith.constant 0 : i32
    %c0_i32_0 = arith.constant 0 : i32
    return %arg0, %c0_i32 : i32, i32
  }
  func.func @transform_1(%arg0: i32) -> (i32, i32) {
    %c0_i32 = arith.constant 0 : i32
    %c0_i32_0 = arith.constant 0 : i32
    return %arg0, %c0_i32 : i32, i32
  }
  func.func @transform_2(%arg0: i32) -> (i32, i32) {
    %c0_i32 = arith.constant 0 : i32
    %c0_i32_0 = arith.constant 0 : i32
    %c0_i32_1 = arith.constant 0 : i32
    return %c0_i32, %c0_i32_0 : i32, i32
  }
  func.func @transform_3(%arg0: i32) -> (i32, i32) {
    %c0_i32 = arith.constant 0 : i32
    %c0_i32_0 = arith.constant 0 : i32
    %c0_i32_1 = arith.constant 0 : i32
    return %c0_i32, %c0_i32_0 : i32, i32
  }
  func.func @transform_4(%arg0: i32) -> (i32, i32) {
    %c0_i32 = arith.constant 0 : i32
    %c0_i32_0 = arith.constant 0 : i32
    %c0_i32_1 = arith.constant 0 : i32
    return %c0_i32, %c0_i32_0 : i32, i32
  }
  func.func @transform_5(%arg0: i32) -> (i32, i32) {
    %c0_i32 = arith.constant 0 : i32
    %c0_i32_0 = arith.constant 0 : i32
    %c0_i32_1 = arith.constant 0 : i32
    return %c0_i32, %c0_i32_0 : i32, i32
  }
  func.func @transform_6(%arg0: i32) -> (i32, i32) {
    %c0_i32 = arith.constant 0 : i32
    %c0_i32_0 = arith.constant 0 : i32
    %c0_i32_1 = arith.constant 0 : i32
    return %c0_i32, %c0_i32_0 : i32, i32
  }
  func.func @transform_7(%arg0: i32) -> (i32, i32) {
    %c0_i32 = arith.constant 0 : i32
    %c0_i32_0 = arith.constant 0 : i32
    return %arg0, %c0_i32 : i32, i32
  }
}

</mosaic_0001>

<bundles_post_ra>
// kernel: tpu_custom_call.1
= control target key start
LH: loop header
LB: loop body
LE: loop exit
PB: predicated region body
PF: predicated region fallthrough
CT: control target
= control target key end

     0   :  { %12 = vsyncpa [#allocation3], 0  ;;  %s1046_s0 = inlined_call_operand.vmem [shape: f32[32,8], index: 0, kind: input, shape index: {}]   ;;  %s1047_s1 = inlined_call_operand.vmem [shape: f32[32,1], index: 1, kind: input, shape index: {}]   ;;  %s1048_s2 = inlined_call_operand.vmem [shape: f32[16,128], index: 2, kind: input, shape index: {}]   ;;  %s1049_s3 = inlined_call_operand.hbm [shape: bf16[8,128], index: 3, kind: input, shape index: {}]   ;;  %s1050_s4 = inlined_call_operand.vmem [shape: f32[1,128], index: 4, kind: input, shape index: {}]   ;;  %s1051_s5 = inlined_call_operand.vmem [shape: bf16[128,128], index: 5, kind: input, shape index: {}]   ;;  %s1052_s6 = inlined_call_operand.vmem [shape: f32[1,128], index: 6, kind: input, shape index: {}]   ;;  %s1053_s7 = inlined_call_operand.hbm [shape: f32[32,128], index: 7, kind: output, shape index: {}]  }
   0x1   :  { %13 = vsyncpa [#allocation4], 0 }
   0x2   :  { %15 = vsyncpa [#allocation4 + $0x1], 0  ;;  %s881_s24 = smov 0   ;;  %s883_s25 = smov 0  }
   0x3   :  { %s885_s26 = smov 0   ;;  %s887_s27 = smov 0  }
   0x4 LB: > { %s902_s28 = sadd.s32 4294967295, %s832_s27   ;;  %s613_s29 = sadd.s32 4294967294, %s832_s27   ;;  %s832_s27 = sphi %s887_s27, %s1061_s27   ;;  %s828_s26 = sphi %s885_s26, %s1060_s26   ;;  %s824_s25 = sphi %s883_s25, %s1059_s25   ;;  %s820_s24 = sphi %s881_s24, %s1058_s24  }
   0x5   : > { %s906_s30 = sadd.s32 1, %s832_s27   ;;  %s185_s8 = sadd.s32 1, %s828_s26 }
   0x6   : > { %s182_s9 = ssub.s32 %s832_s27, %s906_s30  ;;  %p195_p0 = scmp.ne.s32.totalorder %s828_s26, %s824_s25 }
   0x7   : > { %p183_p1 = scmp.eq.s32.totalorder %s182_s9, 0  ;;  %p196_p2 = scmp.eq.s32.totalorder %s902_s28, 1 }
   0x8   : > { %p201_p3 = scmp.ne.s32.totalorder %s824_s25, %s820_s24  ;;  %p202_p4 = scmp.eq.s32.totalorder %s613_s29, 1 }
   0x9   : > { %s917_s10 = scalar_select %p183_p1, %s828_s26, %s185_s8  }
   0xa   : > { %p919_p5 = por %p196_p2, %p195_p0  ;;  %p923_p6 = por %p202_p4, %p201_p3 }
   0xb   : > { %p614_p7 = scmp.ge.s32.totalorder %s832_s27, 1  ;;  %p209_p8 = scmp.lt.s32.totalorder %s832_s27, 3 }
   0xc   : > { %s1055_s12 = scalar_select %p923_p6, 1, 0 }
   0xd   : > { %p692_p9 = scmp.eq.s32.totalorder %s902_s28, 0  ;;  %p930_p10 = pnand %p614_p7, %p209_p8 }
   0xe   : > { %s834_s14 = smov [#allocation2]  }
   0xf   : > { %s225_s15 = sshll.u32 %s834_s14, 4  ;;  %p684_p11 = pneg %p930_p10  ;;  %s226_s15 = int_to_ptr.vmem [resolvable:$true] %s225_s15 }
  0x10   : > { %s753_s16 = scalar_lea.vmem %s226_s15, 64  ;;  %p761_p3 = scmp.lt.s32.totalorder %s226_s15, %s226_s15 }
  0x11   : > { %p685_p12 = pnand %p692_p9, %p684_p11  ;;  %p754_p0 = scmp.ne.s32.totalorder %s226_s15, %s753_s16 }
  0x12   : > { %p762_p4 = scmp.lt.s32.totalorder %s753_s16, %s753_s16 }
  0x13   : > { %p744_p13 = pneg %p685_p12 }
  0x14   : > { %p763_p6 = por %p762_p4, %p761_p3 }
  0x15   : > { %p756_p1 = pnand %p754_p0, %p744_p13 }
  0x17   : > { %p757_p2 = pneg %p756_p1 }
  0x19   : > { %p764_p7 = pnand %p763_p6, %p757_p2 }
  0x1b   : > { %767 = shalt.err (!%p764_p7)
}
  0x1c   : > { %687 = dma.hbm_to_vmem [thread:$0]  (!%p685_p12), %s1049_s3, 64, %s226_s15, [#allocation3]  }
  0x1d   : > { %265 = sbr.rel (%p930_p10) target bundleno = 466 (0x1d2), region = 48 }
  0x22   : > { %811 = dma.done.wait (%p692_p9), [#allocation3], 64  }
  0x23   : > { %813 = vsyncadd (%p692_p9), [#allocation3], 4294967232  ;;  %s620_s19 = sshll.u32 %s902_s28, 1  ;;  %v835_v0 = vmov 0.0   ;;  %vm836_vm0 = vmmov 0   ;;  %vm331_vm1 = vcmask 1043456  }
  0x24   : > { %652 = vmatprep.subr.bf16.mxu0 %v835_v0  ;;  %654 = vmatprep.mubr.msk.bf16.mxu0 %vm836_vm0, %v835_v0  ;;  %p303_p6 = scmp.lt.s32.totalorder %s620_s19, 3  ;;  %v319_v1 = vld [vmem:[#allocation2] sm:$0xf]  ;;  %v734_v6 = vld [vmem:[%s1051_s5 + $0x38] sm:$0xff]   ;;  %vm327_vm2 = vcmask 64512   ;;  %v735_v7 = vld [vmem:[%s1051_s5 + $0x30] sm:$0xff]  }
  0x25   : > { %658 = vmatprep.subr.bf16.mxu1 %v835_v0  ;;  %674 = vmatprep.mubr.msk.bf16.mxu1 %vm836_vm0, %v835_v0  ;;  %v333_v4 = vsel %vm331_vm1, %v319_v1, 0  ;;  %v736_v8 = vld [vmem:[%s1051_s5 + $0x28] sm:$0xff]   ;;  %v737_v9 = vld [vmem:[%s1051_s5 + $0x20] sm:$0xff]   ;;  %v738_v10 = vld [vmem:[%s1051_s5 + $0x18] sm:$0xff]   ;;  %v837_v14 = vmov 0   ;;  %s299_s21 = sand.u32 1, %s824_s25  }
  0x26   : > { %s1063_s19 = smov (!%p303_p6, %s620_s19), 3  ;;  %653 = vmatpush3.bf16.msra.mxu0 %v333_v4  ;;  %659 = vmatpush3.bf16.msra.mxu1 %v734_v6  ;;  %v739_v11 = vld [vmem:[%s1051_s5 + $0x10] sm:$0xff]   ;;  %v740_v12 = vld [vmem:[%s1051_s5 + $0x8] sm:$0xff]   ;;  %v741_v13 = vld [vmem:[%s1051_s5] sm:$0xff]   ;;  %s619_s22 = sshll.u32 %s299_s21, 4 }
  0x27   : > { %s621_s20 = sshll.u32 %s1063_s19, 3  ;;  %660 = vmatprep.subr.bf16.mxu1 %v835_v0  ;;  %733 = vset.pattern.permute.xlu0 %v837_v14  ;;  %v624_v17 = vld [vmem:[%s1050_s4] ss:$0 sm:$0xff]  ;;  %s301_s8 = scalar_lea.vmem [#allocation5], %s619_s22  ;;  %v508_v41 = vld [vmem:[%s1048_s2 + $0x8] sm:$0xff] }
  0x28   : > { %s306_s23 = scalar_lea.vmem %s1046_s0, %s621_s20  ;;  %s312_s16 = scalar_lea.vmem %s1047_s1, %s621_s20  ;;  %v626_v27 = vld [vmem:[%s1052_s6] ss:$0 sm:$0xff] }
  0x29   : > { %v316_v2 = vld [vmem:[%s306_s23] sm:$0xff]  ;;  %v317_v3 = vld [vmem:[%s306_s23 + $0x8] sm:$0xff]  ;;  %s527_s9 = sshll.u32 %s301_s8, 4  ;;  %s640_s13 = sshll.u32 %s902_s28, 8  ;;  %s999_s9 = int_to_ptr.vmem [resolvable:$true] %s527_s9 }
  0x2a   : > { %v318_v5 = vpack.c.bf16 %v317_v3, %v316_v2  ;;  %661 = vmatpush3.bf16.msra.mxu1 %v735_v7  ;;  %v493_v15 = vld [vmem:[%s312_s16] sm:$0xff]  ;;  %v494_v16 = vld [vmem:[%s312_s16 + $0x8] sm:$0xff]  ;;  %s1004_s18 = scalar_lea.hbm %s1053_s7, %s640_s13  ;;  %s1006_s28 = scalar_lea.sflag [#allocation4], %s299_s21 }
  0x2b   : > { %662 = vmatprep.subr.bf16.mxu1 %v835_v0  ;;  %497 = vperm.xlu0 %733, %v493_v15   ;;  %v507_v33 = vld [vmem:[%s1048_s2] sm:$0xff]  ;;  %s768_s19 = scalar_lea.vmem %s999_s9, 256  ;;  %s838_s20 = smov [#allocation5]  }
  0x2c   : > { %655 = vmatmul.mubr.msk.bf16.vlgmr.msra.gmra.mxu0 %vm327_vm2, %v318_v5  ;;  %p769_p8 = scmp.ne.s32.totalorder %s999_s9, %s768_s19  ;;  %s772_s22 = sshll.u32 %s838_s20, 4  ;;  %s773_s22 = int_to_ptr.vmem [resolvable:$false] %s772_s22 }
  0x2d   : > { %s774_s23 = scalar_lea.vmem %s773_s22, 512  ;;  %p775_p11 = scmp.lt.s32.totalorder %s999_s9, %s773_s22 }
  0x2e   : > { %663 = vmatpush3.bf16.msra.mxu1 %v736_v8  ;;  %p770_p9 = pnand %p769_p8, %p919_p5  ;;  %p776_p12 = scmp.lt.s32.totalorder %s774_s23, %s768_s19 }
  0x2f   : > { %664 = vmatprep.subr.bf16.mxu1 %v835_v0  ;;  %502 = vperm.xlu0 %733, %v494_v16  }
  0x30   : > { %p771_p10 = pneg %p770_p9  ;;  %p777_p13 = por %p776_p12, %p775_p11 }
  0x32   : > { %665 = vmatpush3.bf16.msra.mxu1 %v737_v9  ;;  %p778_p0 = pnand %p777_p13, %p771_p10 }
  0x33   : > { %666 = vmatprep.subr.bf16.mxu1 %v835_v0 }
  0x36   : > { %667 = vmatpush3.bf16.msra.mxu1 %v738_v10 }
  0x37   : > { %668 = vmatprep.subr.bf16.mxu1 %v835_v0 }
  0x3a   : > { %669 = vmatpush3.bf16.msra.mxu1 %v739_v11 }
  0x3b   : > { %670 = vmatprep.subr.bf16.mxu1 %v835_v0 }
  0x3e   : > { %671 = vmatpush3.bf16.msra.mxu1 %v740_v12 }
  0x3f   : > { %672 = vmatprep.subr.bf16.mxu1 %v835_v0 }
  0x42   : > { %673 = vmatpush3.bf16.msra.mxu1 %v741_v13 }
  0xa6   : > { %v498_v30 = vpop.permute.xlu0 %497 }
  0xaa   : > { %v503_v40 = vpop.permute.xlu0 %502 }
  0xec   : > { %v369_v18 = vpop.f32.mrf.mxu0 }
  0xed   : > { %v370_v20 = vadd.f32 %v624_v17, %v369_v18 }
  0xee   : > { %v656_v19 = vpop.f32.mrf.mxu0 }
  0xef   : > { %v376_v24 = vmax.f32 %v370_v20, 0.0 }
  0xf0   : > { %v372_v21 = vpop.f32.mrf.mxu0 }
  0xf1   : > { %v373_v22 = vadd.f32 %v624_v17, %v372_v21 }
  0xf2   : > { %v657_v23 = vpop.f32.mrf.mxu0 }
  0xf3   : > { %v377_v25 = vmax.f32 %v373_v22, 0.0 }
  0xf5   : > { %v378_v26 = vpack.c.bf16 %v377_v25, %v376_v24 }
  0xf7   : > { %675 = vmatmul.mubr.bf16.vlgmr.msra.gmra.mxu1 %v378_v26 }
 0x1b7   : > { %v484_v28 = vpop.f32.mrf.mxu1 }
 0x1b8   : > { %v485_v29 = vadd.f32 %v626_v27, %v484_v28 }
 0x1b9   : > { %v676_v31 = vpop.f32.mrf.mxu1 }
 0x1ba   : > { %v491_v32 = vmax.f32 %v485_v29, 0.0 }
 0x1bb   : > { %v487_v34 = vpop.f32.mrf.mxu1 }
 0x1bc   : > { %v505_v35 = vmul.f32 %v498_v30, %v491_v32  ;;  %v488_v36 = vadd.f32 %v626_v27, %v487_v34 }
 0x1bd   : > { %v677_v37 = vpop.f32.mrf.mxu1 }
 0x1be   : > { %v509_v38 = vadd.f32 %v507_v33, %v505_v35  ;;  %v492_v39 = vmax.f32 %v488_v36, 0.0 }
 0x1c0   : > { %511 = vst [vmem:[%s301_s8] sm:$0xff] %v509_v38  ;;  %v506_v42 = vmul.f32 %v503_v40, %v492_v39 }
 0x1c2   : > { %v510_v43 = vadd.f32 %v508_v41, %v506_v42 }
 0x1c4   : > { %512 = vst [vmem:[%s301_s8 + $0x8] sm:$0xff] %v510_v43 }
 0x1c5   : > { %781 = shalt.err (!%p778_p0)
}
 0x1c6   : > { %s782_s21 = scalar_lea.hbm %s1004_s18, 256  ;;  %s786_s13 = scalar_lea.hbm %s1053_s7, 512 }
 0x1c7   : > { %p783_p1 = scmp.ne.s32.totalorder %s1004_s18, %s782_s21  ;;  %p787_p4 = scmp.lt.s32.totalorder %s1004_s18, %s1053_s7 }
 0x1c8   : > { %p788_p7 = scmp.lt.s32.totalorder %s786_s13, %s782_s21 }
 0x1c9   : > { %p784_p2 = pnand %p783_p1, %p919_p5 }
 0x1ca   : > { %p789_p6 = por %p788_p7, %p787_p4 }
 0x1cb   : > { %p785_p3 = pneg %p784_p2 }
 0x1cd   : > { %p790_p8 = pnand %p789_p6, %p785_p3 }
 0x1cf   : > { %793 = shalt.err (!%p790_p8)
}
 0x1d0   : > { %s839_s16 = smov 128   ;;  %s840_s17 = smov 8  }
 0x1d1   : > { %682 = dma.vmem_to_hbm [thread:$0]  (%p919_p5), %s999_s9, 256, %s1004_s18, %s1006_s28, %s839_s16, %s839_s16, %s840_s17  }
 0x1d2 PF: > { %p694_p9 = scmp.ge.s32.totalorder %s832_s27, 2  ;;  %s542_s19 = sand.u32 1, %s820_s24  }
 0x1d3   : > { %p1057_p10 = scmp.ne.s32.totalorder %s1055_s12, 0  ;;  %s543_s20 = scalar_lea.sflag [#allocation4], %s542_s19 }
 0x1d5   : > { %p689_p11 = pnand %p694_p9, %p1057_p10 }
 0x1d7   : > { %p690_p12 = pneg %p689_p11 }
 0x1d9   : > { %815 = dma.done.wait (%p690_p12), %s543_s20, 256  }
 0x1da   : > { %817 = vsyncadd (%p690_p12), %s543_s20, 4294967040  ;;  %p18_p13 = scmp.ge.s32.totalorder %s906_s30, 4   ;;  %s1058_s24 = smov %s824_s25 }
 0x1db   : > { %s1059_s25 = smov %s828_s26  ;;  %s1060_s26 = smov %s917_s10 }
 0x1dc   : > { %s1061_s27 = smov %s906_s30  ;;  %20 = sbr.rel (!%p18_p13) target bundleno = 4 (0x4), region = 91 }
 0x1e1   :  { %548 = vsyncpa [#allocation3], 1 }
 0x1e2   :  { %550 = vsyncpa [#allocation3 + $0x1], 1 }
 0x1e3   :  { %551 = vsyncpa [#allocation4], 1 }
 0x1e4   :  { %553 = vsyncpa [#allocation4 + $0x1], 1 }

</bundles_post_ra>
